<compile_context>
chip_gen: v5e
topology: v5e:2x2
jax: 0.10.0
libtpu: 0.0.40
codegen_flags: <defaults>
</compile_context>

<pallas_src>
import functools

import numpy as np
import jax
import jax.numpy as jnp
from jax.experimental import pallas as pl
from jax.experimental.pallas import tpu as pltpu

LEVELS = [8, 5, 5, 5]       # FSQ levels -> codebook_dim D = 4
NUM_QUANTIZERS = 3          # residual quantizer depth Q
EPS = 1e-3                  # matches FSQuantizer.bound eps


def _fsq_constants(levels):
    """Per-channel FSQ constants as tuples of Python floats (baked into kernel)."""
    lv_i = np.asarray(levels, dtype=np.int32)
    lv_f = lv_i.astype(np.float32)
    half_l = ((lv_f - np.float32(1.0)) * np.float32(1.0 + EPS) / np.float32(2.0)).astype(np.float32)
    offset = np.where(lv_i % 2 == 0, np.float32(0.5), np.float32(0.0)).astype(np.float32)
    shift = np.arctanh(offset / half_l).astype(np.float32)
    half_width = (lv_i // 2).astype(np.float32)
    basis = np.cumprod(np.concatenate([[1], list(levels[:-1])]).astype(np.int64)).astype(np.float32)
    as_floats = lambda a: tuple(float(v) for v in a)
    return tuple(as_floats(a) for a in (half_l, offset, shift, half_width, basis))


def _cdiv(a, b):
    return -(-a // b)


def _pick_tile_rows(nr, batch, target=1024, min_steps=8):
    """Row-tile size for the (NR, 128) spatial slab.

    Rules:
      * nr <= 8: use the full dim (always a legal block shape).
      * otherwise TM is a multiple of 8 (<= target); the grid uses
        ceil(NR/TM) steps and Pallas masks the ragged last block.
      * TM shrinks (staying >= 8) until batch * ceil(NR/TM) >= min_steps so
        v7x's two TensorCores each get a few pipelined steps.
    """
    if nr <= 8:
        return nr
    tm = nr if nr <= target else (target // 8) * 8
    while tm > 8 and batch * _cdiv(nr, tm) < min_steps:
        tm = max(8, ((tm // 2) // 8) * 8)
    return tm


def _rfsq_kernel(x_ref, idx_ref, qout_ref, *, consts, num_quantizers):
    """One (batch, row-tile) block of the residual FSQ forward pass.

    x_ref:    (1, D, TM, 128) float32  input block
    idx_ref:  (1, Q, TM, 128) int32    per-quantizer codebook indices
    qout_ref: (1, D, TM, 128) float32  summed quantized output
    """
    half_l, offset, shift, half_width, basis = consts
    d = len(half_l)
    # Per-quantizer constant sum_c hw_c * basis_c (the "+ half_width" of
    # codes_to_indices folded across channels) — added once per quantizer.
    idx_bias = float(sum(hw * b for hw, b in zip(half_width, basis)))

    idx_acc = [None] * num_quantizers            # per-quantizer index accumulators (f32, exact)
    for c in range(d):                           # static unroll over the tiny channel dim
        res = x_ref[0, c]                        # (TM, 128) f32, lane/sublane-dense slab
        inv_hw = 1.0 / half_width[c]             # exact: half widths are powers of two
        qsum = None
        for q in range(num_quantizers):          # static unroll over quantizers
            # FSQuantizer.bound + round_ste (forward = round-to-nearest-even).
            # shift/offset are exactly 0.0 for the odd-level channels: skip the
            # adds in Python rather than relying on Mosaic to fold them.
            z = res + shift[c] if shift[c] != 0.0 else res
            bounded = jnp.tanh(z) * half_l[c]
            if offset[c] != 0.0:
                bounded = bounded - offset[c]
            quant = jnp.round(bounded)           # integer-valued f32 in [-hw, hw]
            # codes_to_indices contribution: (quant/hw)*hw*basis == quant*basis
            # (the +hw*basis part lives in idx_bias).
            contrib = quant if basis[c] == 1.0 else quant * basis[c]
            idx_acc[q] = contrib if idx_acc[q] is None else idx_acc[q] + contrib
            code = quant * inv_hw                # quantize(); bf16 cast in torch is lossless here
            qsum = code if qsum is None else qsum + code
            if q < num_quantizers - 1:           # last residual update is dead — skip it
                res = res - code                 # residual update (== torch f32 - bf16 code)
        # torch accumulates quantized_out in bf16; exact for these levels, so f32 path is identical
        qout_ref[0, c] = qsum
    for q in range(num_quantizers):
        # Values are exact non-negative integers <= 999: truncation in the cast is exact.
        idx_ref[0, q] = (idx_acc[q] + idx_bias).astype(jnp.int32)


def residual_fsq_forward(x, levels=LEVELS, num_quantizers=NUM_QUANTIZERS, target_tile_rows=1024):
    """x: (B, D, H, W) float32 (NCHW). Returns (indices, quantized_out, loss_out)."""
    B, D, H, W = x.shape
    assert D == len(levels)
    N = H * W
    assert N % 128 == 0, "flattened spatial size must be a multiple of 128 (TPU lane width)"
    NR = N // 128
    Q = num_quantizers
    TM = _pick_tile_rows(NR, B, target=target_tile_rows)
    grid_n = _cdiv(NR, TM)

    # (B, D, H, W) -> (B, D, NR, 128): contiguous reshape, no data movement.
    x_r = x.reshape(B, D, NR, 128).astype(jnp.float32)
    consts = _fsq_constants(levels)
    kernel = functools.partial(_rfsq_kernel, consts=consts, num_quantizers=Q)

    # Scheduling hint for XLA (elementwise; tanh dominates the "transcendentals" bucket).
    npos = B * NR * 128
    cost = pl.CostEstimate(
        flops=int(npos * (6 * D * Q + 2 * Q)),
        transcendentals=int(npos * D * Q),
        bytes_accessed=int(npos * 4 * (2 * D + Q)))

    # VMEM budget: in + idx + qout blocks (double-buffered) plus compute temporaries.
    # Capped at 48 MiB so it is always safe on v7x (64 MiB physical per TC) while
    # still raising v5e's 16 MiB scoped default.
    block_bytes = (2 * D + Q) * 4 * TM * 128
    vmem_limit = int(min(48 << 20, max(32 << 20, 3 * block_bytes)))

    idx_r, qout_r = pl.pallas_call(
        kernel,
        out_shape=(jax.ShapeDtypeStruct((B, Q, NR, 128), jnp.int32),
                   jax.ShapeDtypeStruct((B, D, NR, 128), jnp.float32)),
        grid_spec=pltpu.PrefetchScalarGridSpec(
            num_scalar_prefetch=0,
            grid=(B, grid_n),
            in_specs=[pl.BlockSpec((1, D, TM, 128), lambda b, n: (b, 0, n, 0))],
            out_specs=(pl.BlockSpec((1, Q, TM, 128), lambda b, n: (b, 0, n, 0)),
                       pl.BlockSpec((1, D, TM, 128), lambda b, n: (b, 0, n, 0)))),
        compiler_params=pltpu.CompilerParams(
            dimension_semantics=("parallel", "parallel"),
            vmem_limit_bytes=vmem_limit),
        cost_estimate=cost,
    )(x_r)

    indices = idx_r.reshape(B, Q, H, W)          # torch.stack(indices, dim=1)
    quantized_out = qout_r.reshape(B, D, H, W)   # ResidualFSQuantizer dtype = float32
    # dummy_loss is zeros_like(out.mean(dim=[1,2,3], keepdim=True)) summed over layers -> zeros
    loss_out = jnp.zeros((B, 1, 1, 1), jnp.float32)
    return indices, quantized_out, loss_out


def _reference_forward(x, levels=LEVELS, num_quantizers=NUM_QUANTIZERS):
    """Pure-JAX reference mirroring the torch forward (bf16 accumulation path)."""
    half_l, offset, shift, half_width, basis = (
        jnp.asarray(c, dtype=jnp.float32) for c in _fsq_constants(levels))
    B, D, H, W = x.shape
    residual = jnp.transpose(x, (0, 2, 3, 1)).reshape(B, H * W, D).astype(jnp.float32)
    qout = jnp.zeros_like(residual, dtype=jnp.bfloat16)
    idxs = []
    for _ in range(num_quantizers):
        bounded = jnp.tanh(residual + shift) * half_l - offset
        quantized = jnp.round(bounded)
        codes = quantized / half_width
        zs = codes * half_width + half_width
        idxs.append(jnp.sum(zs * basis, axis=-1).astype(jnp.int32))
        zb = codes.astype(jnp.bfloat16)
        residual = residual - zb.astype(jnp.float32)
        qout = qout + zb
    indices = jnp.stack(idxs, axis=1).reshape(B, num_quantizers, H, W)
    quantized_out = jnp.transpose(qout.astype(jnp.float32).reshape(B, H, W, D), (0, 3, 1, 2))
    return indices, quantized_out


if __name__ == "__main__":
    key = jax.random.PRNGKey(0)
    B, D, H, W = 2, len(LEVELS), 16, 16
    x = jax.random.normal(key, (B, D, H, W), dtype=jnp.float32) * 0.7

    indices, quantized_out, loss_out = residual_fsq_forward(x)
    jax.block_until_ready((indices, quantized_out, loss_out))

    # Shape / dtype checks against the torch forward semantics.
    assert indices.shape == (B, NUM_QUANTIZERS, H, W) and indices.dtype == jnp.int32
    assert quantized_out.shape == (B, D, H, W) and quantized_out.dtype == jnp.float32
    assert loss_out.shape == (B, 1, 1, 1) and loss_out.dtype == jnp.float32

    # Numerical check against the pure-JAX reference.  tanh ULP differences can
    # in principle flip a round-to-nearest decision at a boundary, hence the
    # loose (fraction-based) gates.
    ref_idx, ref_q = _reference_forward(x)
    idx_match = np.mean(np.asarray(indices) == np.asarray(ref_idx))
    assert idx_match >= 0.99, f"index mismatch fraction too high: {1 - idx_match}"
    q_match = np.mean(np.abs(np.asarray(quantized_out) - np.asarray(ref_q)) <= 1e-5)
    assert q_match >= 0.99, f"quantized mismatch fraction too high: {1 - q_match}"

    print("KERNEL_OK")
</pallas_src>

<mosaic_0001>
module attributes {stable_mosaic.version = 11 : i64} {
  func.func @_rfsq_kernel(%arg0: i32, %arg1: i32, %arg2: memref<1x4x2x128xf32, #tpu.memory_space<vmem>>, %arg3: memref<1x3x2x128xi32, #tpu.memory_space<vmem>>, %arg4: memref<1x4x2x128xf32, #tpu.memory_space<vmem>>) attributes {dimension_semantics = [#tpu.dimension_semantics<parallel>, #tpu.dimension_semantics<parallel>], iteration_bounds = array<i64: 2, 1>, scalar_prefetch = 0 : i64, scratch_operands = 0 : i64, tpu.core_type = #tpu.core_type<tc>, window_params = [{transform_indices = @transform_0, window_bounds = array<i64: 1, 4, 2, 128>}, {transform_indices = @transform_1, window_bounds = array<i64: 1, 3, 2, 128>}, {transform_indices = @transform_2, window_bounds = array<i64: 1, 4, 2, 128>}]} {
    %c0 = arith.constant 0 : index
    %c0_0 = arith.constant 0 : index
    %c0_1 = arith.constant 0 : index
    %c0_2 = arith.constant 0 : index
    %0 = vector.load %arg2[%c0, %c0_0, %c0_1, %c0_2] : memref<1x4x2x128xf32, #tpu.memory_space<vmem>>, vector<1x1x2x128xf32>
    %1 = vector.shape_cast %0 : vector<1x1x2x128xf32> to vector<2x128xf32>
    %cst = arith.constant 0.143695354 : f32
    %2 = vector.broadcast %cst : f32 to vector<2x128xf32>
    %3 = arith.addf %1, %2 : vector<2x128xf32>
    %4 = math.tanh %3 : vector<2x128xf32>
    %cst_3 = arith.constant 3.50350022 : f32
    %5 = vector.broadcast %cst_3 : f32 to vector<2x128xf32>
    %6 = arith.mulf %4, %5 : vector<2x128xf32>
    %cst_4 = arith.constant 5.000000e-01 : f32
    %7 = vector.broadcast %cst_4 : f32 to vector<2x128xf32>
    %8 = arith.subf %6, %7 : vector<2x128xf32>
    %9 = math.roundeven %8 : vector<2x128xf32>
    %cst_5 = arith.constant 2.500000e-01 : f32
    %10 = vector.broadcast %cst_5 : f32 to vector<2x128xf32>
    %11 = arith.mulf %9, %10 : vector<2x128xf32>
    %12 = arith.subf %1, %11 : vector<2x128xf32>
    %cst_6 = arith.constant 0.143695354 : f32
    %13 = vector.broadcast %cst_6 : f32 to vector<2x128xf32>
    %14 = arith.addf %12, %13 : vector<2x128xf32>
    %15 = math.tanh %14 : vector<2x128xf32>
    %cst_7 = arith.constant 3.50350022 : f32
    %16 = vector.broadcast %cst_7 : f32 to vector<2x128xf32>
    %17 = arith.mulf %15, %16 : vector<2x128xf32>
    %cst_8 = arith.constant 5.000000e-01 : f32
    %18 = vector.broadcast %cst_8 : f32 to vector<2x128xf32>
    %19 = arith.subf %17, %18 : vector<2x128xf32>
    %20 = math.roundeven %19 : vector<2x128xf32>
    %cst_9 = arith.constant 2.500000e-01 : f32
    %21 = vector.broadcast %cst_9 : f32 to vector<2x128xf32>
    %22 = arith.mulf %20, %21 : vector<2x128xf32>
    %23 = arith.addf %11, %22 : vector<2x128xf32>
    %24 = arith.subf %12, %22 : vector<2x128xf32>
    %cst_10 = arith.constant 0.143695354 : f32
    %25 = vector.broadcast %cst_10 : f32 to vector<2x128xf32>
    %26 = arith.addf %24, %25 : vector<2x128xf32>
    %27 = math.tanh %26 : vector<2x128xf32>
    %cst_11 = arith.constant 3.50350022 : f32
    %28 = vector.broadcast %cst_11 : f32 to vector<2x128xf32>
    %29 = arith.mulf %27, %28 : vector<2x128xf32>
    %cst_12 = arith.constant 5.000000e-01 : f32
    %30 = vector.broadcast %cst_12 : f32 to vector<2x128xf32>
    %31 = arith.subf %29, %30 : vector<2x128xf32>
    %32 = math.roundeven %31 : vector<2x128xf32>
    %cst_13 = arith.constant 2.500000e-01 : f32
    %33 = vector.broadcast %cst_13 : f32 to vector<2x128xf32>
    %34 = arith.mulf %32, %33 : vector<2x128xf32>
    %35 = arith.addf %23, %34 : vector<2x128xf32>
    %c0_14 = arith.constant 0 : index
    %c0_15 = arith.constant 0 : index
    %c0_16 = arith.constant 0 : index
    %c0_17 = arith.constant 0 : index
    %36 = vector.load %arg4[%c0_14, %c0_15, %c0_16, %c0_17] : memref<1x4x2x128xf32, #tpu.memory_space<vmem>>, vector<1x1x2x128xf32>
    %37 = vector.shape_cast %36 : vector<1x1x2x128xf32> to vector<2x128xf32>
    %38 = vector.shape_cast %35 : vector<2x128xf32> to vector<1x1x2x128xf32>
    tpu.vector_store %arg4[%c0_14, %c0_15, %c0_16, %c0_17], %38 {strides = array<i32>} : memref<1x4x2x128xf32, #tpu.memory_space<vmem>>, vector<1x1x2x128xf32>,
    %c0_18 = arith.constant 0 : index
    %c1 = arith.constant 1 : index
    %c0_19 = arith.constant 0 : index
    %c0_20 = arith.constant 0 : index
    %39 = vector.load %arg2[%c0_18, %c1, %c0_19, %c0_20] : memref<1x4x2x128xf32, #tpu.memory_space<vmem>>, vector<1x1x2x128xf32>
    %40 = vector.shape_cast %39 : vector<1x1x2x128xf32> to vector<2x128xf32>
    %41 = math.tanh %40 : vector<2x128xf32>
    %cst_21 = arith.constant 2.002000e+00 : f32
    %42 = vector.broadcast %cst_21 : f32 to vector<2x128xf32>
    %43 = arith.mulf %41, %42 : vector<2x128xf32>
    %44 = math.roundeven %43 : vector<2x128xf32>
    %cst_22 = arith.constant 8.000000e+00 : f32
    %45 = vector.broadcast %cst_22 : f32 to vector<2x128xf32>
    %46 = arith.mulf %44, %45 : vector<2x128xf32>
    %47 = arith.addf %9, %46 : vector<2x128xf32>
    %cst_23 = arith.constant 5.000000e-01 : f32
    %48 = vector.broadcast %cst_23 : f32 to vector<2x128xf32>
    %49 = arith.mulf %44, %48 : vector<2x128xf32>
    %50 = arith.subf %40, %49 : vector<2x128xf32>
    %51 = math.tanh %50 : vector<2x128xf32>
    %cst_24 = arith.constant 2.002000e+00 : f32
    %52 = vector.broadcast %cst_24 : f32 to vector<2x128xf32>
    %53 = arith.mulf %51, %52 : vector<2x128xf32>
    %54 = math.roundeven %53 : vector<2x128xf32>
    %cst_25 = arith.constant 8.000000e+00 : f32
    %55 = vector.broadcast %cst_25 : f32 to vector<2x128xf32>
    %56 = arith.mulf %54, %55 : vector<2x128xf32>
    %57 = arith.addf %20, %56 : vector<2x128xf32>
    %cst_26 = arith.constant 5.000000e-01 : f32
    %58 = vector.broadcast %cst_26 : f32 to vector<2x128xf32>
    %59 = arith.mulf %54, %58 : vector<2x128xf32>
    %60 = arith.addf %49, %59 : vector<2x128xf32>
    %61 = arith.subf %50, %59 : vector<2x128xf32>
    %62 = math.tanh %61 : vector<2x128xf32>
    %cst_27 = arith.constant 2.002000e+00 : f32
    %63 = vector.broadcast %cst_27 : f32 to vector<2x128xf32>
    %64 = arith.mulf %62, %63 : vector<2x128xf32>
    %65 = math.roundeven %64 : vector<2x128xf32>
    %cst_28 = arith.constant 8.000000e+00 : f32
    %66 = vector.broadcast %cst_28 : f32 to vector<2x128xf32>
    %67 = arith.mulf %65, %66 : vector<2x128xf32>
    %68 = arith.addf %32, %67 : vector<2x128xf32>
    %cst_29 = arith.constant 5.000000e-01 : f32
    %69 = vector.broadcast %cst_29 : f32 to vector<2x128xf32>
    %70 = arith.mulf %65, %69 : vector<2x128xf32>
    %71 = arith.addf %60, %70 : vector<2x128xf32>
    %c0_30 = arith.constant 0 : index
    %c1_31 = arith.constant 1 : index
    %c0_32 = arith.constant 0 : index
    %c0_33 = arith.constant 0 : index
    %72 = vector.load %arg4[%c0_30, %c1_31, %c0_32, %c0_33] : memref<1x4x2x128xf32, #tpu.memory_space<vmem>>, vector<1x1x2x128xf32>
    %73 = vector.shape_cast %72 : vector<1x1x2x128xf32> to vector<2x128xf32>
    %74 = vector.shape_cast %71 : vector<2x128xf32> to vector<1x1x2x128xf32>
    tpu.vector_store %arg4[%c0_30, %c1_31, %c0_32, %c0_33], %74 {strides = array<i32>} : memref<1x4x2x128xf32, #tpu.memory_space<vmem>>, vector<1x1x2x128xf32>,
    %c0_34 = arith.constant 0 : index
    %c2 = arith.constant 2 : index
    %c0_35 = arith.constant 0 : index
    %c0_36 = arith.constant 0 : index
    %75 = vector.load %arg2[%c0_34, %c2, %c0_35, %c0_36] : memref<1x4x2x128xf32, #tpu.memory_space<vmem>>, vector<1x1x2x128xf32>
    %76 = vector.shape_cast %75 : vector<1x1x2x128xf32> to vector<2x128xf32>
    %77 = math.tanh %76 : vector<2x128xf32>
    %cst_37 = arith.constant 2.002000e+00 : f32
    %78 = vector.broadcast %cst_37 : f32 to vector<2x128xf32>
    %79 = arith.mulf %77, %78 : vector<2x128xf32>
    %80 = math.roundeven %79 : vector<2x128xf32>
    %cst_38 = arith.constant 4.000000e+01 : f32
    %81 = vector.broadcast %cst_38 : f32 to vector<2x128xf32>
    %82 = arith.mulf %80, %81 : vector<2x128xf32>
    %83 = arith.addf %47, %82 : vector<2x128xf32>
    %cst_39 = arith.constant 5.000000e-01 : f32
    %84 = vector.broadcast %cst_39 : f32 to vector<2x128xf32>
    %85 = arith.mulf %80, %84 : vector<2x128xf32>
    %86 = arith.subf %76, %85 : vector<2x128xf32>
    %87 = math.tanh %86 : vector<2x128xf32>
    %cst_40 = arith.constant 2.002000e+00 : f32
    %88 = vector.broadcast %cst_40 : f32 to vector<2x128xf32>
    %89 = arith.mulf %87, %88 : vector<2x128xf32>
    %90 = math.roundeven %89 : vector<2x128xf32>
    %cst_41 = arith.constant 4.000000e+01 : f32
    %91 = vector.broadcast %cst_41 : f32 to vector<2x128xf32>
    %92 = arith.mulf %90, %91 : vector<2x128xf32>
    %93 = arith.addf %57, %92 : vector<2x128xf32>
    %cst_42 = arith.constant 5.000000e-01 : f32
    %94 = vector.broadcast %cst_42 : f32 to vector<2x128xf32>
    %95 = arith.mulf %90, %94 : vector<2x128xf32>
    %96 = arith.addf %85, %95 : vector<2x128xf32>
    %97 = arith.subf %86, %95 : vector<2x128xf32>
    %98 = math.tanh %97 : vector<2x128xf32>
    %cst_43 = arith.constant 2.002000e+00 : f32
    %99 = vector.broadcast %cst_43 : f32 to vector<2x128xf32>
    %100 = arith.mulf %98, %99 : vector<2x128xf32>
    %101 = math.roundeven %100 : vector<2x128xf32>
    %cst_44 = arith.constant 4.000000e+01 : f32
    %102 = vector.broadcast %cst_44 : f32 to vector<2x128xf32>
    %103 = arith.mulf %101, %102 : vector<2x128xf32>
    %104 = arith.addf %68, %103 : vector<2x128xf32>
    %cst_45 = arith.constant 5.000000e-01 : f32
    %105 = vector.broadcast %cst_45 : f32 to vector<2x128xf32>
    %106 = arith.mulf %101, %105 : vector<2x128xf32>
    %107 = arith.addf %96, %106 : vector<2x128xf32>
    %c0_46 = arith.constant 0 : index
    %c2_47 = arith.constant 2 : index
    %c0_48 = arith.constant 0 : index
    %c0_49 = arith.constant 0 : index
    %108 = vector.load %arg4[%c0_46, %c2_47, %c0_48, %c0_49] : memref<1x4x2x128xf32, #tpu.memory_space<vmem>>, vector<1x1x2x128xf32>
    %109 = vector.shape_cast %108 : vector<1x1x2x128xf32> to vector<2x128xf32>
    %110 = vector.shape_cast %107 : vector<2x128xf32> to vector<1x1x2x128xf32>
    tpu.vector_store %arg4[%c0_46, %c2_47, %c0_48, %c0_49], %110 {strides = array<i32>} : memref<1x4x2x128xf32, #tpu.memory_space<vmem>>, vector<1x1x2x128xf32>,
    %c0_50 = arith.constant 0 : index
    %c3 = arith.constant 3 : index
    %c0_51 = arith.constant 0 : index
    %c0_52 = arith.constant 0 : index
    %111 = vector.load %arg2[%c0_50, %c3, %c0_51, %c0_52] : memref<1x4x2x128xf32, #tpu.memory_space<vmem>>, vector<1x1x2x128xf32>
    %112 = vector.shape_cast %111 : vector<1x1x2x128xf32> to vector<2x128xf32>
    %113 = math.tanh %112 : vector<2x128xf32>
    %cst_53 = arith.constant 2.002000e+00 : f32
    %114 = vector.broadcast %cst_53 : f32 to vector<2x128xf32>
    %115 = arith.mulf %113, %114 : vector<2x128xf32>
    %116 = math.roundeven %115 : vector<2x128xf32>
    %cst_54 = arith.constant 2.000000e+02 : f32
    %117 = vector.broadcast %cst_54 : f32 to vector<2x128xf32>
    %118 = arith.mulf %116, %117 : vector<2x128xf32>
    %119 = arith.addf %83, %118 : vector<2x128xf32>
    %cst_55 = arith.constant 5.000000e-01 : f32
    %120 = vector.broadcast %cst_55 : f32 to vector<2x128xf32>
    %121 = arith.mulf %116, %120 : vector<2x128xf32>
    %122 = arith.subf %112, %121 : vector<2x128xf32>
    %123 = math.tanh %122 : vector<2x128xf32>
    %cst_56 = arith.constant 2.002000e+00 : f32
    %124 = vector.broadcast %cst_56 : f32 to vector<2x128xf32>
    %125 = arith.mulf %123, %124 : vector<2x128xf32>
    %126 = math.roundeven %125 : vector<2x128xf32>
    %cst_57 = arith.constant 2.000000e+02 : f32
    %127 = vector.broadcast %cst_57 : f32 to vector<2x128xf32>
    %128 = arith.mulf %126, %127 : vector<2x128xf32>
    %129 = arith.addf %93, %128 : vector<2x128xf32>
    %cst_58 = arith.constant 5.000000e-01 : f32
    %130 = vector.broadcast %cst_58 : f32 to vector<2x128xf32>
    %131 = arith.mulf %126, %130 : vector<2x128xf32>
    %132 = arith.addf %121, %131 : vector<2x128xf32>
    %133 = arith.subf %122, %131 : vector<2x128xf32>
    %134 = math.tanh %133 : vector<2x128xf32>
    %cst_59 = arith.constant 2.002000e+00 : f32
    %135 = vector.broadcast %cst_59 : f32 to vector<2x128xf32>
    %136 = arith.mulf %134, %135 : vector<2x128xf32>
    %137 = math.roundeven %136 : vector<2x128xf32>
    %cst_60 = arith.constant 2.000000e+02 : f32
    %138 = vector.broadcast %cst_60 : f32 to vector<2x128xf32>
    %139 = arith.mulf %137, %138 : vector<2x128xf32>
    %140 = arith.addf %104, %139 : vector<2x128xf32>
    %cst_61 = arith.constant 5.000000e-01 : f32
    %141 = vector.broadcast %cst_61 : f32 to vector<2x128xf32>
    %142 = arith.mulf %137, %141 : vector<2x128xf32>
    %143 = arith.addf %132, %142 : vector<2x128xf32>
    %c0_62 = arith.constant 0 : index
    %c3_63 = arith.constant 3 : index
    %c0_64 = arith.constant 0 : index
    %c0_65 = arith.constant 0 : index
    %144 = vector.load %arg4[%c0_62, %c3_63, %c0_64, %c0_65] : memref<1x4x2x128xf32, #tpu.memory_space<vmem>>, vector<1x1x2x128xf32>
    %145 = vector.shape_cast %144 : vector<1x1x2x128xf32> to vector<2x128xf32>
    %146 = vector.shape_cast %143 : vector<2x128xf32> to vector<1x1x2x128xf32>
    tpu.vector_store %arg4[%c0_62, %c3_63, %c0_64, %c0_65], %146 {strides = array<i32>} : memref<1x4x2x128xf32, #tpu.memory_space<vmem>>, vector<1x1x2x128xf32>,
    %cst_66 = arith.constant 5.000000e+02 : f32
    %147 = vector.broadcast %cst_66 : f32 to vector<2x128xf32>
    %148 = arith.addf %119, %147 : vector<2x128xf32>
    %149 = arith.fptosi %148 : vector<2x128xf32> to vector<2x128xi32>
    %c0_67 = arith.constant 0 : index
    %c0_68 = arith.constant 0 : index
    %c0_69 = arith.constant 0 : index
    %c0_70 = arith.constant 0 : index
    %150 = vector.load %arg3[%c0_67, %c0_68, %c0_69, %c0_70] : memref<1x3x2x128xi32, #tpu.memory_space<vmem>>, vector<1x1x2x128xi32>
    %151 = vector.shape_cast %150 : vector<1x1x2x128xi32> to vector<2x128xi32>
    %152 = vector.shape_cast %149 : vector<2x128xi32> to vector<1x1x2x128xi32>
    tpu.vector_store %arg3[%c0_67, %c0_68, %c0_69, %c0_70], %152 {strides = array<i32>} : memref<1x3x2x128xi32, #tpu.memory_space<vmem>>, vector<1x1x2x128xi32>,
    %cst_71 = arith.constant 5.000000e+02 : f32
    %153 = vector.broadcast %cst_71 : f32 to vector<2x128xf32>
    %154 = arith.addf %129, %153 : vector<2x128xf32>
    %155 = arith.fptosi %154 : vector<2x128xf32> to vector<2x128xi32>
    %c0_72 = arith.constant 0 : index
    %c1_73 = arith.constant 1 : index
    %c0_74 = arith.constant 0 : index
    %c0_75 = arith.constant 0 : index
    %156 = vector.load %arg3[%c0_72, %c1_73, %c0_74, %c0_75] : memref<1x3x2x128xi32, #tpu.memory_space<vmem>>, vector<1x1x2x128xi32>
    %157 = vector.shape_cast %156 : vector<1x1x2x128xi32> to vector<2x128xi32>
    %158 = vector.shape_cast %155 : vector<2x128xi32> to vector<1x1x2x128xi32>
    tpu.vector_store %arg3[%c0_72, %c1_73, %c0_74, %c0_75], %158 {strides = array<i32>} : memref<1x3x2x128xi32, #tpu.memory_space<vmem>>, vector<1x1x2x128xi32>,
    %cst_76 = arith.constant 5.000000e+02 : f32
    %159 = vector.broadcast %cst_76 : f32 to vector<2x128xf32>
    %160 = arith.addf %140, %159 : vector<2x128xf32>
    %161 = arith.fptosi %160 : vector<2x128xf32> to vector<2x128xi32>
    %c0_77 = arith.constant 0 : index
    %c2_78 = arith.constant 2 : index
    %c0_79 = arith.constant 0 : index
    %c0_80 = arith.constant 0 : index
    %162 = vector.load %arg3[%c0_77, %c2_78, %c0_79, %c0_80] : memref<1x3x2x128xi32, #tpu.memory_space<vmem>>, vector<1x1x2x128xi32>
    %163 = vector.shape_cast %162 : vector<1x1x2x128xi32> to vector<2x128xi32>
    %164 = vector.shape_cast %161 : vector<2x128xi32> to vector<1x1x2x128xi32>
    tpu.vector_store %arg3[%c0_77, %c2_78, %c0_79, %c0_80], %164 {strides = array<i32>} : memref<1x3x2x128xi32, #tpu.memory_space<vmem>>, vector<1x1x2x128xi32>,
    return
  }
  func.func @transform_0(%arg0: i32, %arg1: i32) -> (i32, i32, i32, i32) {
    %c0_i32 = arith.constant 0 : i32
    %c0_i32_0 = arith.constant 0 : i32
    %c0_i32_1 = arith.constant 0 : i32
    return %arg0, %c0_i32, %arg1, %c0_i32_0 : i32, i32, i32, i32
  }
  func.func @transform_1(%arg0: i32, %arg1: i32) -> (i32, i32, i32, i32) {
    %c0_i32 = arith.constant 0 : i32
    %c0_i32_0 = arith.constant 0 : i32
    %c0_i32_1 = arith.constant 0 : i32
    return %arg0, %c0_i32, %arg1, %c0_i32_0 : i32, i32, i32, i32
  }
  func.func @transform_2(%arg0: i32, %arg1: i32) -> (i32, i32, i32, i32) {
    %c0_i32 = arith.constant 0 : i32
    %c0_i32_0 = arith.constant 0 : i32
    %c0_i32_1 = arith.constant 0 : i32
    return %arg0, %c0_i32, %arg1, %c0_i32_0 : i32, i32, i32, i32
  }
}

</mosaic_0001>

<bundles_post_ra>
// kernel: tpu_custom_call.1
= control target key start
LH: loop header
LB: loop body
LE: loop exit
PB: predicated region body
PF: predicated region fallthrough
CT: control target
= control target key end

     0   :  { %8 = vsyncpa [#allocation3], 0  ;;  %s1060_s0 = inlined_call_operand.hbm [shape: f32[2,4,2,128], index: 0, kind: input, shape index: {}]   ;;  %s1061_s1 = inlined_call_operand.hbm [shape: s32[2,3,2,128], index: 1, kind: output, shape index: {0}]   ;;  %s1062_s2 = inlined_call_operand.hbm [shape: f32[2,4,2,128], index: 2, kind: output, shape index: {1}]  }
   0x1   :  { %10 = vsyncpa [#allocation3 + $0x1], 0 }
   0x2   :  { %11 = vsyncpa [#allocation4], 0 }
   0x3   :  { %13 = vsyncpa [#allocation4 + $0x1], 0 }
   0x4   :  { %14 = vsyncpa [#allocation7], 0 }
   0x5   :  { %16 = vsyncpa [#allocation7 + $0x1], 0  ;;  %s869_s9 = smov 0   ;;  %s871_s10 = smov 0  }
   0x6   :  { %s873_s11 = smov 0   ;;  %s875_s12 = smov 0  }
   0x7   :  { %s877_s13 = smov 0   ;;  %s879_s14 = smov 0  }
   0x8 LB: > { %s467_s15 = sadd.s32 4294967295, %s848_s14   ;;  %s468_s16 = sadd.s32 4294967294, %s848_s14   ;;  %s848_s14 = sphi %s879_s14, %s22_s14   ;;  %s844_s13 = sphi %s877_s13, %s1071_s13   ;;  %s840_s12 = sphi %s875_s12, %s1070_s12   ;;  %s836_s11 = sphi %s873_s11, %s1069_s11   ;;  %s832_s10 = sphi %s871_s10, %s1068_s10   ;;  %s828_s9 = sphi %s869_s9, %s1067_s9  }
   0x9   : > { %s34_s17 = sadd.s32 1, %s844_s13  ;;  %s43_s18 = sadd.s32 1, %s836_s11 }
   0xa   : > { %p36_p0 = scmp.ge.s32.totalorder %s34_s17, 2  ;;  %p50_p1 = scmp.ne.s32.totalorder %s836_s11, %s832_s10 }
   0xb   : > { %p51_p2 = scmp.eq.s32.totalorder %s848_s14, 0  ;;  %p56_p3 = scmp.ne.s32.totalorder %s832_s10, %s828_s9 }
   0xc   : > { %s1073_s17 = smov (%p36_p0, %s34_s17), 0  ;;  %p57_p5 = scmp.eq.s32.totalorder %s467_s15, 0 }
   0xd   : > { %p910_p4 = por %p51_p2, %p50_p1  ;;  %s38_s20 = ssub.s32 %s844_s13, %s1073_s17 }
   0xe   : > { %p82_p6 = scmp.eq.s32.totalorder %s467_s15, 1  ;;  %p41_p7 = scmp.eq.s32.totalorder %s38_s20, 0 }
   0xf   : > { %p916_p8 = por %p57_p5, %p56_p3  ;;  %p88_p10 = scmp.eq.s32.totalorder %s468_s16, 1 }
  0x10   : > { %p920_p9 = por %p82_p6, %p50_p1  ;;  %p470_p12 = scmp.ge.s32.totalorder %s848_s14, 2 }
  0x11   : > { %s925_s23 = scalar_select %p41_p7, %s836_s11, %s43_s18  }
  0x12   : > { %p927_p11 = por %p88_p10, %p56_p3  ;;  %p626_p13 = scmp.lt.s32.totalorder %s848_s14, 2 }
  0x13   : > { %s136_s25 = sand.u32 1, %s836_s11   ;;  %s494_s27 = sshll.u32 %s844_s13, 3 }
  0x14   : > { %s471_s26 = sshll.u32 %s136_s25, 3  ;;  %s146_s30 = scalar_lea.hbm %s1060_s0, %s494_s27 }
  0x15   : > { %s140_s3 = scalar_lea.vmem [#allocation2], %s471_s26  ;;  %s147_s5 = sshll.u32 %s146_s30, 4  ;;  %s148_s5 = int_to_ptr.hbm [resolvable:$true] %s147_s5 }
  0x16   : > { %s149_s4 = sshll.u32 %s140_s3, 4  ;;  %p616_p0 = pnand %p626_p13, %p910_p4  ;;  %s150_s4 = int_to_ptr.vmem [resolvable:$true] %s149_s4 }
  0x17   : > { %p474_p1 = scmp.ge.s32.totalorder %s848_s14, 1  ;;  %s137_s6 = scalar_lea.sflag [#allocation3], %s136_s25 }
  0x18   : > { %s850_s7 = smov 32   ;;  %s851_s8 = smov 2  }
  0x19   : > { %618 = dma.hbm_to_vmem [thread:$0]  (!%p616_p0), %s148_s5, 128, %s150_s4, %s137_s6, %s850_s7, %s850_s7, %s851_s8  }
  0x1a   : > { %p157_p2 = scmp.lt.s32.totalorder %s848_s14, 3 }
  0x1c   : > { %p158_p3 = pnand %p474_p1, %p157_p2 }
  0x1d   : > { %s943_s15 = sand.u32 (!%p158_p3), 1, %s832_s10  }
  0x1e   : > { %161 = sbr.rel (%p158_p3) target bundleno = 132 (0x84), region = 24  ;;  %s475_s16 = sshll.u32 (!%p158_p3), %s943_s15, 3 }
  0x1f   : > { %s164_s18 = scalar_lea.sflag (!%p158_p3), [#allocation3], %s943_s15  ;;  %s167_s19 = scalar_lea.vmem (!%p158_p3), [#allocation2], %s475_s16 }
  0x23   : > { %815 = dma.done.wait (%p916_p8), %s164_s18, 128  }
  0x24   : > { %817 = vsyncadd (%p916_p8), %s164_s18, 4294967168  ;;  %v194_v0 = vld [vmem:[%s167_s19] sm:$0x3]  ;;  %v480_v1 = vld [vmem:[%s167_s19 + $0x2] sm:$0x3]  ;;  %s496_s20 = smul.u32 6, %s943_s15 }
  0x25   : > { %v482_v2 = vld [vmem:[%s167_s19 + $0x4] sm:$0x3]  ;;  %v195_v3 = vadd.f32 0.14369535, %v194_v0  ;;  %680 = vtanh.f32 %v480_v1  ;;  %v484_v4 = vld [vmem:[%s167_s19 + $0x6] sm:$0x3] }
  0x26   : > { %682 = vtanh.f32 %v482_v2  ;;  %s983_s21 = scalar_lea.vmem [#allocation5], %s496_s20  ;;  %s193_s25 = scalar_lea.vmem [#allocation6], %s475_s16 }
  0x27   : > { %684 = vtanh.f32 %v195_v3  ;;  %s495_s26 = sshll.u32 %s840_s12, 3  ;;  %s344_s30 = sshll.u32 %s193_s25, 4  ;;  %s1000_s30 = int_to_ptr.vmem [resolvable:$true] %s344_s30 }
  0x28   : > { %686 = vtanh.f32 %v484_v4  ;;  %s343_s29 = scalar_lea.hbm %s1062_s2, %s495_s26  ;;  %s608_s4 = smul.u32 6, %s840_s12 }
  0x29   : > { %s346_s3 = sshll.u32 %s343_s29, 4  ;;  %s313_s8 = scalar_lea.sflag [#allocation7], %s943_s15  ;;  %s347_s3 = int_to_ptr.hbm [resolvable:$true] %s346_s3 }
  0x2a   : > { %s325_s7 = scalar_lea.hbm %s1061_s1, %s608_s4  ;;  %s748_s16 = sshra.s32 %s347_s3, 4  ;;  %s749_s16 = int_to_ptr.hbm [resolvable:$true] %s748_s16 }
  0x2b   : > { %v681_v5 = vpop.eup %680  ;;  %s750_s18 = scalar_lea.hbm %s749_s16, 8  ;;  %s754_s12 = scalar_lea.hbm %s1062_s2, 16 }
  0x2c   : > { %v683_v6 = vpop.eup %682  ;;  %v221_v7 = vmul.f32 2.002, %v681_v5  ;;  %p751_p4 = scmp.ne.s32.totalorder %s749_s16, %s750_s18  ;;  %p755_p7 = scmp.lt.s32.totalorder %s749_s16, %s1062_s2 }
  0x2d   : > { %v685_v8 = vpop.eup %684  ;;  %v247_v9 = vmul.f32 2.002, %v683_v6  ;;  %p756_p8 = scmp.lt.s32.totalorder %s754_s12, %s750_s18 }
  0x2e   : > { %v687_v10 = vpop.eup %686  ;;  %v197_v11 = vmul.f32 3.5035002, %v685_v8  ;;  %v521_v12 = vand.u32 2147483647, %v221_v7  ;;  %v523_v13 = vcvt.f32.s32 %v221_v7  ;;  %v526_v18 = vand.u32 2147483648, %v221_v7  ;;  %p752_p5 = pnand %p751_p4, %p920_p9 }
  0x2f   : > { %v547_v14 = vcvt.f32.s32 %v247_v9  ;;  %v273_v15 = vmul.f32 2.002, %v687_v10  ;;  %v545_v19 = vand.u32 2147483647, %v247_v9  ;;  %v550_v21 = vand.u32 2147483648, %v247_v9  ;;  %p757_p10 = por %p756_p8, %p755_p7 }
  0x30   : > { %v477_v16 = vadd.f32 -0.5, %v197_v11  ;;  %v524_v17 = vcvt.s32.f32 %v523_v13  ;;  %vm522_vm0 = vcmp.lt.f32.partialorder %v521_v12, 8388608.0  ;;  %p753_p6 = pneg %p752_p5 }
  0x31   : > { %v548_v20 = vcvt.s32.f32 %v547_v14  ;;  %v571_v22 = vcvt.f32.s32 %v273_v15  ;;  %v569_v25 = vand.u32 2147483647, %v273_v15  ;;  %v574_v29 = vand.u32 2147483648, %v273_v15 }
  0x32   : > { %v499_v23 = vcvt.f32.s32 %v477_v16  ;;  %v525_v24 = vand.u32 2147483647, %v524_v17  ;;  %v497_v26 = vand.u32 2147483647, %v477_v16  ;;  %v502_v31 = vand.u32 2147483648, %v477_v16  ;;  %p758_p13 = pnand %p757_p10, %p753_p6 }
  0x33   : > { %v549_v27 = vand.u32 2147483647, %v548_v20  ;;  %v572_v28 = vcvt.s32.f32 %v571_v22  ;;  %vm546_vm1 = vcmp.lt.f32.partialorder %v545_v19, 8388608.0  ;;  %vm570_vm2 = vcmp.lt.f32.partialorder %v569_v25, 8388608.0 }
  0x34   : > { %v500_v30 = vcvt.s32.f32 %v499_v23  ;;  %v527_v32 = vor.u32 %v526_v18, %v525_v24  ;;  %vm498_vm3 = vcmp.lt.f32.partialorder %v497_v26, 8388608.0 }
  0x35   : > { %v551_v33 = vor.u32 %v550_v21, %v549_v27  ;;  %v573_v34 = vand.u32 2147483647, %v572_v28 }
  0x36   : > { %v501_v35 = vand.u32 2147483647, %v500_v30  ;;  %v528_v36 = vsel %vm522_vm0, %v527_v32, %v221_v7 }
  0x37   : > { %v953_v37 = vmul.f32 0.5, %v528_v36  ;;  %v552_v38 = vsel %vm546_vm1, %v551_v33, %v247_v9  ;;  %v575_v39 = vor.u32 %v574_v29, %v573_v34 }
  0x38   : > { %v503_v40 = vor.u32 %v502_v31, %v501_v35  ;;  %v955_v41 = vmul.f32 0.5, %v552_v38  ;;  %v249_v25 = vmul.f32 40.0, %v552_v38 }
  0x39   : > { %v226_v42 = vsub.f32 %v480_v1, %v953_v37  ;;  %v576_v43 = vsel %vm570_vm2, %v575_v39, %v273_v15 }
  0x3a   : > { %v504_v44 = vsel %vm498_vm3, %v503_v40, %v477_v16  ;;  %v252_v45 = vsub.f32 %v482_v2, %v955_v41  ;;  %v959_v46 = vmul.f32 0.5, %v576_v43  ;;  %v223_v16 = vmul.f32 8.0, %v528_v36 }
  0x3b   : > { %v961_v47 = vmul.f32 0.25, %v504_v44  ;;  %688 = vtanh.f32 %v226_v42  ;;  %v275_v31 = vmul.f32 200.0, %v576_v43 }
  0x3c   : > { %690 = vtanh.f32 %v252_v45  ;;  %v964_v48 = vsub.f32 %v484_v4, %v959_v46  ;;  %v224_v23 = vadd.f32 %v504_v44, %v223_v16 }
  0x3d   : > { %v967_v49 = vsub.f32 %v194_v0, %v961_v47 }
  0x3e   : > { %692 = vtanh.f32 %v964_v48  ;;  %v250_v30 = vadd.f32 %v249_v25, %v224_v23 }
  0x3f   : > { %v202_v50 = vadd.f32 0.14369535, %v967_v49 }
  0x40   : > { %v276_v35 = vadd.f32 %v275_v31, %v250_v30 }
  0x41   : > { %v689_v51 = vpop.eup %688  ;;  %694 = vtanh.f32 %v202_v50 }
  0x42   : > { %v691_v52 = vpop.eup %690  ;;  %v228_v53 = vmul.f32 2.002, %v689_v51  ;;  %v296_v44 = vadd.f32 500.0, %v276_v35 }
  0x43   : > { %v254_v54 = vmul.f32 2.002, %v691_v52 }
  0x44   : > { %v693_v55 = vpop.eup %692  ;;  %v531_v56 = vcvt.f32.s32 %v228_v53  ;;  %v529_v57 = vand.u32 2147483647, %v228_v53  ;;  %v534_v61 = vand.u32 2147483648, %v228_v53  ;;  %vm593_vm8 = vcmp.lt.s32.totalorder %v296_v44, 0 }
  0x45   : > { %v555_v58 = vcvt.f32.s32 %v254_v54  ;;  %v280_v59 = vmul.f32 2.002, %v693_v55  ;;  %v553_v62 = vand.u32 2147483647, %v254_v54  ;;  %v558_v1 = vand.u32 2147483648, %v254_v54 }
  0x46   : > { %v532_v60 = vcvt.s32.f32 %v531_v56  ;;  %vm530_vm4 = vcmp.lt.f32.partialorder %v529_v57, 8388608.0 }
  0x47   : > { %v695_v63 = vpop.eup %694  ;;  %v556_v0 = vcvt.s32.f32 %v555_v58  ;;  %v579_v2 = vcvt.f32.s32 %v280_v59  ;;  %v577_v5 = vand.u32 2147483647, %v280_v59  ;;  %vm554_vm5 = vcmp.lt.f32.partialorder %v553_v62, 8388608.0 }
  0x48   : > { %v204_v3 = vmul.f32 3.5035002, %v695_v63  ;;  %v533_v4 = vand.u32 2147483647, %v532_v60  ;;  %v582_v10 = vand.u32 2147483648, %v280_v59 }
  0x49   : > { %v557_v6 = vand.u32 2147483647, %v556_v0  ;;  %v580_v7 = vcvt.s32.f32 %v579_v2  ;;  %vm578_vm6 = vcmp.lt.f32.partialorder %v577_v5, 8388608.0 }
  0x4a   : > { %v478_v8 = vadd.f32 -0.5, %v204_v3  ;;  %v535_v9 = vor.u32 %v534_v61, %v533_v4 }
  0x4b   : > { %v559_v11 = vor.u32 %v558_v1, %v557_v6  ;;  %v581_v12 = vand.u32 2147483647, %v580_v7 }
  0x4c   : > { %v507_v13 = vcvt.f32.s32 %v478_v8  ;;  %v536_v14 = vsel %vm530_vm4, %v535_v9, %v228_v53  ;;  %v505_v15 = vand.u32 2147483647, %v478_v8  ;;  %v510_v20 = vand.u32 2147483648, %v478_v8 }
  0x4d   : > { %v232_v17 = vmul.f32 0.5, %v536_v14  ;;  %v560_v18 = vsel %vm554_vm5, %v559_v11, %v254_v54  ;;  %v583_v22 = vor.u32 %v582_v10, %v581_v12  ;;  %v230_v27 = vmul.f32 8.0, %v536_v14 }
  0x4e   : > { %v508_v19 = vcvt.s32.f32 %v507_v13  ;;  %v971_v21 = vmul.f32 0.5, %v560_v18  ;;  %vm506_vm7 = vcmp.lt.f32.partialorder %v505_v15, 8388608.0  ;;  %v256_v34 = vmul.f32 40.0, %v560_v18 }
  0x4f   : > { %v234_v24 = vsub.f32 %v226_v42, %v232_v17  ;;  %v584_v29 = vsel %vm578_vm6, %v583_v22, %v280_v59  ;;  %v594_v53 = vceil.f32 %v296_v44  ;;  %v595_v54 = vfloor.f32 %v296_v44 }
  0x50   : > { %v509_v26 = vand.u32 2147483647, %v508_v19  ;;  %v260_v28 = vsub.f32 %v252_v45, %v971_v21  ;;  %v974_v33 = vmul.f32 0.5, %v584_v29  ;;  %v282_v42 = vmul.f32 200.0, %v584_v29 }
  0x51   : > { %696 = vtanh.f32 %v234_v24  ;;  %v596_v58 = vsel %vm593_vm8, %v594_v53, %v595_v54  ;;  %v259_v23 = vadd.f32 %v971_v21, %v955_v41 }
  0x52   : > { %v511_v32 = vor.u32 %v510_v20, %v509_v26  ;;  %698 = vtanh.f32 %v260_v28  ;;  %v286_v38 = vsub.f32 %v964_v48, %v974_v33  ;;  %v285_v31 = vadd.f32 %v974_v33, %v959_v46 }
  0x54   : > { %v512_v36 = vsel %vm506_vm7, %v511_v32, %v478_v8  ;;  %700 = vtanh.f32 %v286_v38  ;;  %v233_v8 = vadd.f32 %v232_v17, %v953_v37 }
  0x55   : > { %v978_v39 = vmul.f32 0.25, %v512_v36  ;;  %v231_v40 = vadd.f32 %v512_v36, %v230_v27 }
  0x57   : > { %v697_v45 = vpop.eup %696  ;;  %v209_v43 = vsub.f32 %v967_v49, %v978_v39  ;;  %v257_v50 = vadd.f32 %v256_v34, %v231_v40  ;;  %v597_v49 = vcvt.f32.s32 %v596_v58  ;;  %v208_v33 = vadd.f32 %v978_v39, %v961_v47 }
  0x58   : > { %v699_v51 = vpop.eup %698  ;;  %v236_v52 = vmul.f32 2.002, %v697_v45 }
  0x59   : > { %v210_v55 = vadd.f32 0.14369535, %v209_v43  ;;  %v262_v56 = vmul.f32 2.002, %v699_v51  ;;  %v283_v48 = vadd.f32 %v282_v42, %v257_v50  ;;  %298 = vst [vmem:[%s983_s21] sm:$0x3] %v597_v49 }
  0x5a   : > { %v539_v57 = vcvt.f32.s32 %v236_v52  ;;  %v537_v59 = vand.u32 2147483647, %v236_v52  ;;  %v542_v60 = vand.u32 2147483648, %v236_v52  ;;  %v701_v62 = vpop.eup %700 }
  0x5b   : > { %702 = vtanh.f32 %v210_v55  ;;  %v563_v61 = vcvt.f32.s32 %v262_v56  ;;  %v561_v0 = vand.u32 2147483647, %v262_v56  ;;  %v299_v1 = vadd.f32 500.0, %v283_v48 }
  0x5c   : > { %v540_v63 = vcvt.s32.f32 %v539_v57  ;;  %v566_v3 = vand.u32 2147483648, %v262_v56  ;;  %v288_v4 = vmul.f32 2.002, %v701_v62  ;;  %vm538_vm10 = vcmp.lt.f32.partialorder %v537_v59, 8388608.0 }
  0x5d   : > { %v564_v2 = vcvt.s32.f32 %v563_v61  ;;  %vm598_vm9 = vcmp.lt.s32.totalorder %v299_v1, 0  ;;  %v599_v6 = vceil.f32 %v299_v1  ;;  %v600_v7 = vfloor.f32 %v299_v1 }
  0x5e   : > { %v541_v5 = vand.u32 2147483647, %v540_v63  ;;  %v587_v10 = vcvt.f32.s32 %v288_v4  ;;  %vm562_vm11 = vcmp.lt.f32.partialorder %v561_v0, 8388608.0  ;;  %v585_v12 = vand.u32 2147483647, %v288_v4 }
  0x5f   : > { %v565_v9 = vand.u32 2147483647, %v564_v2  ;;  %v601_v13 = vsel %vm598_vm9, %v599_v6, %v600_v7  ;;  %v590_v18 = vand.u32 2147483648, %v288_v4 }
  0x60   : > { %v543_v11 = vor.u32 %v542_v60, %v541_v5  ;;  %v588_v16 = vcvt.s32.f32 %v587_v10  ;;  %v602_v19 = vcvt.f32.s32 %v601_v13  ;;  %vm586_vm12 = vcmp.lt.f32.partialorder %v585_v12, 8388608.0 }
  0x61   : > { %v703_v14 = vpop.eup %702  ;;  %v567_v15 = vor.u32 %v566_v3, %v565_v9 }
  0x62   : > { %v212_v20 = vmul.f32 3.5035002, %v703_v14  ;;  %v544_v22 = vsel %vm538_vm10, %v543_v11, %v236_v52  ;;  %v589_v24 = vand.u32 2147483647, %v588_v16  ;;  %486 = vst [vmem:[%s983_s21 + $0x2] sm:$0x3] %v602_v19 }
  0x63   : > { %v240_v37 = vmul.f32 0.5, %v544_v22  ;;  %v568_v17 = vsel %vm562_vm11, %v567_v15, %v262_v56  ;;  %v238_v40 = vmul.f32 8.0, %v544_v22 }
  0x64   : > { %v479_v25 = vadd.f32 -0.5, %v212_v20  ;;  %v266_v26 = vmul.f32 0.5, %v568_v17  ;;  %v591_v28 = vor.u32 %v590_v18, %v589_v24  ;;  %v264_v42 = vmul.f32 40.0, %v568_v17 }
  0x65   : > { %v241_v27 = vadd.f32 %v240_v37, %v233_v8 }
  0x66   : > { %v515_v29 = vcvt.f32.s32 %v479_v25  ;;  %v267_v30 = vadd.f32 %v266_v26, %v259_v23  ;;  %v513_v32 = vand.u32 2147483647, %v479_v25  ;;  %v592_v41 = vsel %vm586_vm12, %v591_v28, %v288_v4 }
  0x67   : > { %481 = vst [vmem:[%s193_s25 + $0x2] sm:$0x3] %v241_v27  ;;  %v518_v34 = vand.u32 2147483648, %v479_v25  ;;  %v292_v35 = vmul.f32 0.5, %v592_v41  ;;  %v290_v50 = vmul.f32 200.0, %v592_v41 }
  0x68   : > { %v516_v21 = vcvt.s32.f32 %v515_v29  ;;  %483 = vst [vmem:[%s193_s25 + $0x4] sm:$0x3] %v267_v30  ;;  %vm514_vm13 = vcmp.lt.f32.partialorder %v513_v32, 8388608.0 }
  0x69   : > { %v293_v38 = vadd.f32 %v292_v35, %v285_v31 }
  0x6a   : > { %v517_v36 = vand.u32 2147483647, %v516_v21 }
  0x6b   : > { %485 = vst [vmem:[%s193_s25 + $0x6] sm:$0x3] %v293_v38 }
  0x6c   : > { %v519_v46 = vor.u32 %v518_v34, %v517_v36 }
  0x6e   : > { %v520_v44 = vsel %vm514_vm13, %v519_v46, %v479_v25 }
  0x6f   : > { %v215_v45 = vmul.f32 0.25, %v520_v44  ;;  %v239_v43 = vadd.f32 %v520_v44, %v238_v40 }
  0x71   : > { %v216_v51 = vadd.f32 %v215_v45, %v208_v33  ;;  %v265_v52 = vadd.f32 %v264_v42, %v239_v43 }
  0x73   : > { %217 = vst [vmem:[%s193_s25] sm:$0x3] %v216_v51  ;;  %v291_v53 = vadd.f32 %v290_v50, %v265_v52 }
  0x74   : > { %761 = shalt.err (!%p758_p13)
}
  0x75   : > { %s852_s25 = smov 32   ;;  %s853_s28 = smov 2   ;;  %v303_v47 = vadd.f32 500.0, %v291_v53 }
  0x76   : > { %612 = dma.vmem_to_hbm [thread:$0]  (%p920_p9), %s1000_s30, 128, %s347_s3, %s313_s8, %s852_s25, %s852_s25, %s853_s28  }
  0x77   : > { %s326_s29 = sshll.u32 %s983_s21, 4  ;;  %vm603_vm14 = vcmp.lt.s32.totalorder %v303_v47, 0  ;;  %v604_v39 = vceil.f32 %v303_v47  ;;  %v605_v54 = vfloor.f32 %v303_v47  ;;  %s328_s4 = sshll.u32 %s325_s7, 4  ;;  %s327_s29 = int_to_ptr.vmem [resolvable:$true] %s326_s29  ;;  %s329_s4 = int_to_ptr.hbm [resolvable:$true] %s328_s4 }
  0x78   : > { %s308_s5 = scalar_lea.sflag [#allocation4], %s943_s15  ;;  %s776_s6 = sshra.s32 %s329_s4, 4  ;;  %s777_s6 = int_to_ptr.hbm [resolvable:$true] %s776_s6 }
  0x79   : > { %v606_v55 = vsel %vm603_vm14, %v604_v39, %v605_v54  ;;  %s778_s16 = scalar_lea.hbm %s777_s6, 6  ;;  %s782_s8 = scalar_lea.hbm %s1061_s1, 12 }
  0x7a   : > { %v607_v56 = vcvt.f32.s32 %v606_v55  ;;  %p779_p0 = scmp.ne.s32.totalorder %s777_s6, %s778_s16  ;;  %p783_p3 = scmp.lt.s32.totalorder %s777_s6, %s1061_s1 }
  0x7b   : > { %p784_p4 = scmp.lt.s32.totalorder %s782_s8, %s778_s16 }
  0x7c   : > { %487 = vst [vmem:[%s983_s21 + $0x4] sm:$0x3] %v607_v56  ;;  %p780_p1 = pnand %p779_p0, %p920_p9 }
  0x7d   : > { %p785_p5 = por %p784_p4, %p783_p3 }
  0x7e   : > { %p781_p2 = pneg %p780_p1 }
  0x80   : > { %p786_p6 = pnand %p785_p5, %p781_p2 }
  0x82   : > { %789 = shalt.err (!%p786_p6)
}
  0x83   : > { %611 = dma.vmem_to_hbm [thread:$0]  (%p920_p9), %s327_s29, 96, %s329_s4, %s308_s5, %s852_s25, %s852_s25, %s853_s28  }
  0x84 PF: > { %s361_s15 = sand.u32 1, %s828_s9   ;;  %p620_p7 = pnand %p470_p12, %p927_p11 }
  0x85   : > { %s362_s21 = scalar_lea.sflag [#allocation4], %s361_s15 }
  0x86   : > { %p621_p8 = pneg %p620_p7 }
  0x88   : > { %819 = dma.done.wait (%p621_p8), %s362_s21, 96  }
  0x89   : > { %821 = vsyncadd (%p621_p8), %s362_s21, 4294967200  ;;  %s372_s7 = scalar_lea.sflag [#allocation7], %s361_s15 }
  0x8a   : > { %823 = dma.done.wait (%p621_p8), %s372_s7, 128  }
  0x8b   : > { %825 = vsyncadd (%p621_p8), %s372_s7, 4294967168  ;;  %s22_s14 = sadd.s32 1, %s848_s14   ;;  %s1067_s9 = smov %s832_s10 }
  0x8c   : > { %p19_p10 = scmp.ge.s32.totalorder %s22_s14, 4   ;;  %s1068_s10 = smov %s836_s11 }
  0x8d   : > { %s1069_s11 = smov %s925_s23  ;;  %s1070_s12 = smov %s844_s13 }
  0x8e   : > { %s1071_s13 = smov %s1073_s17  ;;  %21 = sbr.rel (!%p19_p10) target bundleno = 8 (0x8), region = 94 }
  0x93   :  { %378 = vsyncpa [#allocation3], 1 }
  0x94   :  { %380 = vsyncpa [#allocation3 + $0x1], 1 }
  0x95   :  { %381 = vsyncpa [#allocation4], 1 }
  0x96   :  { %383 = vsyncpa [#allocation4 + $0x1], 1 }
  0x97   :  { %384 = vsyncpa [#allocation7], 1 }
  0x98   :  { %386 = vsyncpa [#allocation7 + $0x1], 1 }

</bundles_post_ra>
